<compile_context>
chip_gen: v5e
topology: v5e:2x2
jax: 0.10.0
libtpu: 0.0.40
codegen_flags: <defaults>
</compile_context>

<pallas_src>
import jax
import jax.numpy as jnp
from jax.experimental import pallas as pl
from jax.experimental.pallas import tpu as pltpu

INFINITY_PTS_MARGIN = 1e-4
NORMALIZE_GRAD = False   # TODO(synk): register_hook gradient normalization is backward-only; no forward equivalent.
HINGE_LOSS = True
HINGE_LOSS_WEIGHT = 1.0 if HINGE_LOSS else 0.0
CALIBRATED = True

CAM_BLK = 8   # cameras per grid step (one full sublane tile)


# ---------------------------------------------------------------------------
# Fused kernel: ESFM loss over camera blocks + RelativeGT epilogue on last step
# ---------------------------------------------------------------------------
def _combined_kernel(pts_ref, ps_ref, nm_ref, valid_ref,
                     rg_ref, tg_ref, rp_ref, tp_ref,
                     out_ref, acc_sum, acc_cnt):
    i = pl.program_id(0)

    @pl.when(i == 0)
    def _():
        acc_sum[...] = jnp.zeros_like(acc_sum)
        acc_cnt[...] = jnp.zeros_like(acc_cnt)

    # ---- ESFM reprojection loss for this camera block (cameras on sublanes) ----
    X = pts_ref[...]                                               # (4, N)
    P = ps_ref[0]                                                  # (3*CAM_BLK, 4)
    pxyz = jnp.dot(P, X, preferred_element_type=jnp.float32)      # one MXU dot -> (3*CAM_BLK, N)
    px = pxyz[0:CAM_BLK, :]                                        # sublane-tile-aligned slices
    py = pxyz[CAM_BLK:2 * CAM_BLK, :]
    pz = pxyz[2 * CAM_BLK:3 * CAM_BLK, :]

    if HINGE_LOSS:
        mask = pz > INFINITY_PTS_MARGIN            # get_positive_projected_pts_mask
    else:
        mask = jnp.abs(pz) > INFINITY_PTS_MARGIN   # get_projected_pts_mask

    hinge = (INFINITY_PTS_MARGIN - pz) * HINGE_LOSS_WEIGHT
    denom = jnp.where(mask, pz, jnp.ones_like(pz))
    inv_z = pl.reciprocal(denom, approx=False)     # exact recip shared by u and v (rtol=1e-3 test)
    du = px * inv_z - nm_ref[0]
    dv = py * inv_z - nm_ref[1]
    reproj = jnp.sqrt(du * du + dv * dv)           # norm over the xy axis
    per_pt = jnp.where(mask, reproj, hinge)        # (CAM_BLK, N)

    valid = valid_ref[...]                         # (CAM_BLK, N) float {0,1}
    acc_sum[...] += per_pt * valid
    acc_cnt[...] += valid

    # ---- Final reduction + RelativeGT translation loss on the last grid step ----
    @pl.when(i == pl.num_programs(0) - 1)
    def _():
        esfm_sum = jnp.sum(acc_sum[...])
        esfm_cnt = jnp.sum(acc_cnt[...])
        # NOTE: like the PyTorch reference, no guard for esfm_cnt == 0.

        n_pairs = rg_ref.shape[2]                  # M - 1 (static)

        # Leading axis 0 = camera i ("curr"), 1 = camera i+1 ("next"); all the
        # algebra below runs for both pages at once, shapes (2, 1, M-1).
        a = rg_ref[:, 0:1, :]; b = rg_ref[:, 1:2, :]; c = rg_ref[:, 2:3, :]
        d = rg_ref[:, 3:4, :]; e = rg_ref[:, 4:5, :]; f = rg_ref[:, 5:6, :]
        g = rg_ref[:, 6:7, :]; h = rg_ref[:, 7:8, :]; k = rg_ref[:, 8:9, :]
        tgx = tg_ref[:, 0:1, :]; tgy = tg_ref[:, 1:2, :]; tgz = tg_ref[:, 2:3, :]

        # t_gt = -inv(R_gt) @ t via adjugate/determinant, lane-batched over camera pairs.
        det = a * (e * k - f * h) + b * (f * g - d * k) + c * (d * h - e * g)
        inv_det = pl.reciprocal(det, approx=False)
        tg0 = -((e * k - f * h) * tgx + (c * h - b * k) * tgy + (b * f - c * e) * tgz) * inv_det
        tg1 = -((f * g - d * k) * tgx + (a * k - c * g) * tgy + (c * d - a * f) * tgz) * inv_det
        tg2 = -((d * h - e * g) * tgx + (b * g - a * h) * tgy + (a * e - b * d) * tgz) * inv_det

        tpx = tp_ref[:, 0:1, :]; tpy = tp_ref[:, 1:2, :]; tpz = tp_ref[:, 2:3, :]
        # u = t_gt - t_pred, with t_pred = -R_pred^T @ t  =>  u = t_gt + R_pred^T @ t
        u0 = tg0 + (rp_ref[:, 0:1, :] * tpx + rp_ref[:, 3:4, :] * tpy + rp_ref[:, 6:7, :] * tpz)
        u1 = tg1 + (rp_ref[:, 1:2, :] * tpx + rp_ref[:, 4:5, :] * tpy + rp_ref[:, 7:8, :] * tpz)
        u2 = tg2 + (rp_ref[:, 2:3, :] * tpx + rp_ref[:, 5:6, :] * tpy + rp_ref[:, 8:9, :] * tpz)

        # consecutive-camera differences: page 1 ("next") minus page 0 ("curr")
        r0 = u0[1] - u0[0]
        r1 = u1[1] - u1[0]
        r2 = u2[1] - u2[0]
        rel = jnp.sum(jnp.sqrt(r0 * r0 + r1 * r1 + r2 * r2)) / jnp.float32(n_pairs)

        out_ref[0, 0] = rel + esfm_sum / esfm_cnt


# ---------------------------------------------------------------------------
# Wrapper (glue: reshapes / transposes / padding only)
# ---------------------------------------------------------------------------
def combined_loss(Ps, pts3D, norm_M, valid_pts, y):
    M = Ps.shape[0]
    N = pts3D.shape[1]

    Ps32 = Ps.astype(jnp.float32)
    pts32 = pts3D.astype(jnp.float32)
    nm32 = jnp.asarray(norm_M, jnp.float32).reshape(M, 2, N)
    valid_f = valid_pts.astype(jnp.float32).reshape(M, N)

    # Pad the camera axis to a multiple of CAM_BLK; padded cameras carry valid=0
    # and P=0 (-> hinge branch, finite, masked out), so they contribute nothing.
    n_blk = -(-M // CAM_BLK)
    Mp = n_blk * CAM_BLK
    pad = Mp - M
    Ps_p = jnp.pad(Ps32, ((0, pad), (0, 0), (0, 0)))
    nm_p = jnp.pad(nm32, ((0, pad), (0, 0), (0, 0)))
    valid_p = jnp.pad(valid_f, ((0, pad), (0, 0)))

    # (n_blk, 3*CAM_BLK, 4): per block, rows 0:8 = P row0 of the 8 cams, 8:16 = row1, 16:24 = row2.
    ps_packed = (Ps_p.reshape(n_blk, CAM_BLK, 3, 4)
                     .transpose(0, 2, 1, 3)
                     .reshape(n_blk, 3 * CAM_BLK, 4))
    nm_t = nm_p.transpose(1, 0, 2)   # (2, Mp, N)

    # RelativeGT operands: matrix entries on sublanes, camera pairs on lanes;
    # leading axis stacks {camera i, camera i+1} so no in-kernel lane shifts are needed.
    Rg = y[:, 0:3, 0:3].reshape(M, 9).T.astype(jnp.float32)   # (9, M)
    tg = y[:, 0:3, 3].T.astype(jnp.float32)                   # (3, M)
    Rp = Ps32[:, 0:3, 0:3].reshape(M, 9).T                    # (9, M)
    tp = Ps32[:, 0:3, 3].T                                    # (3, M)

    def _pair(x):                                             # (K, M) -> (2, K, M-1)
        return jnp.stack([x[:, :-1], x[:, 1:]], axis=0)

    Rg2, tg2, Rp2, tp2 = _pair(Rg), _pair(tg), _pair(Rp), _pair(tp)
    Md = M - 1

    out = pl.pallas_call(
        _combined_kernel,
        grid_spec=pltpu.PrefetchScalarGridSpec(
            num_scalar_prefetch=0,
            grid=(n_blk,),
            in_specs=[
                pl.BlockSpec((4, N), lambda i: (0, 0)),                    # pts3D (resident)
                pl.BlockSpec((1, 3 * CAM_BLK, 4), lambda i: (i, 0, 0)),    # packed P rows, this block
                pl.BlockSpec((2, CAM_BLK, N), lambda i: (0, i, 0)),        # norm_M, this block
                pl.BlockSpec((CAM_BLK, N), lambda i: (i, 0)),              # valid mask, this block
                pl.BlockSpec((2, 9, Md), lambda i: (0, 0, 0)),             # R_gt   curr/next (resident)
                pl.BlockSpec((2, 3, Md), lambda i: (0, 0, 0)),             # t_gt   curr/next (resident)
                pl.BlockSpec((2, 9, Md), lambda i: (0, 0, 0)),             # R_pred curr/next (resident)
                pl.BlockSpec((2, 3, Md), lambda i: (0, 0, 0)),             # t_pred curr/next (resident)
            ],
            out_specs=pl.BlockSpec(memory_space=pltpu.MemorySpace.SMEM),
            scratch_shapes=[
                pltpu.VMEM((CAM_BLK, N), jnp.float32),   # running sum(per_pt * valid)
                pltpu.VMEM((CAM_BLK, N), jnp.float32),   # running sum(valid)
            ],
        ),
        out_shape=jax.ShapeDtypeStruct((1, 1), jnp.float32),
        # Single serial accumulator keeps everything in one launch. For large M on
        # v7x, per-block partial outputs + dimension_semantics=("parallel",) would
        # use both TensorCores; not worth it at these sizes.
        compiler_params=pltpu.CompilerParams(dimension_semantics=("arbitrary",)),
    )(pts32, ps_packed, nm_t, valid_p, Rg2, tg2, Rp2, tp2)
    return out[0, 0]


# ---------------------------------------------------------------------------
# Pure-JAX reference (mirrors the PyTorch forward) for a correctness check
# ---------------------------------------------------------------------------
def reference_loss(Ps, pts3D, norm_M, valid_pts, y):
    pts_2d = jnp.einsum('mij,jn->min', Ps, pts3D)
    z = pts_2d[:, 2, :]
    if HINGE_LOSS:
        mask = z > INFINITY_PTS_MARGIN
    else:
        mask = jnp.abs(z) > INFINITY_PTS_MARGIN
    hinge = (INFINITY_PTS_MARGIN - z) * HINGE_LOSS_WEIGHT
    denom = jnp.where(mask, z, 1.0)
    p = pts_2d / denom[:, None, :]
    reproj = jnp.linalg.norm(p[:, 0:2, :] - norm_M, axis=1)
    per = jnp.where(mask, reproj, hinge)
    vm = valid_pts.astype(jnp.float32)
    esfm = jnp.sum(per * vm) / jnp.sum(vm)

    R_gt = y[:, 0:3, 0:3]
    t_gt = -jnp.einsum('mij,mj->mi', jnp.linalg.inv(R_gt), y[:, 0:3, 3])
    t_gt_rel = t_gt[1:] - t_gt[:-1]
    R_p = Ps[:, 0:3, 0:3]
    t_p = -jnp.einsum('mji,mj->mi', R_p, Ps[:, 0:3, 3])
    t_p_rel = t_p[1:] - t_p[:-1]
    trans = jnp.mean(jnp.linalg.norm(t_gt_rel - t_p_rel, axis=1))
    return trans + esfm


if __name__ == "__main__":
    M, N = 16, 256   # cameras, 3D points (exercises 2 camera blocks in the grid)

    key = jax.random.PRNGKey(0)
    k1, k2, k3, k4, k5, k6 = jax.random.split(key, 6)

    # pred_cam['Ps_norm'] : (M, 3, 4)
    Ps = jax.random.normal(k1, (M, 3, 4), dtype=jnp.float32) * 0.5
    # pred_cam['pts3D']   : (4, N) homogeneous points
    pts3D = jax.random.normal(k2, (4, N), dtype=jnp.float32)
    pts3D = pts3D.at[3, :].set(1.0)
    # data.norm_M reshaped as (M, 2, N)
    norm_M = jax.random.normal(k3, (M, 2, N), dtype=jnp.float32) * 0.1
    # data.valid_pts : (M, N) boolean
    valid_pts = jax.random.uniform(k4, (M, N)) > 0.1
    valid_pts = valid_pts.at[:, 0].set(True)   # guarantee non-empty mask
    # data.y : (M, 3, 4) ground-truth [R | t] with well-conditioned R
    R_gt = jnp.eye(3, dtype=jnp.float32)[None] + 0.2 * jax.random.normal(
        k5, (M, 3, 3), dtype=jnp.float32)
    t_gt = jax.random.normal(k6, (M, 3, 1), dtype=jnp.float32)
    y = jnp.concatenate([R_gt, t_gt], axis=-1)

    loss = jax.jit(combined_loss)(Ps, pts3D, norm_M, valid_pts, y)
    loss = jax.block_until_ready(loss)

    ref = reference_loss(Ps, pts3D, norm_M, valid_pts, y)
    assert jnp.allclose(loss, ref, rtol=1e-3, atol=1e-4), (loss, ref)

    print("KERNEL_OK")
</pallas_src>

<mosaic_0001>
module attributes {stable_mosaic.version = 11 : i64} {
  func.func @_combined_kernel(%arg0: i32, %arg1: memref<4x256xf32, #tpu.memory_space<vmem>>, %arg2: memref<1x24x4xf32, #tpu.memory_space<vmem>>, %arg3: memref<2x8x256xf32, #tpu.memory_space<vmem>>, %arg4: memref<8x256xf32, #tpu.memory_space<vmem>>, %arg5: memref<2x9x15xf32, #tpu.memory_space<vmem>>, %arg6: memref<2x3x15xf32, #tpu.memory_space<vmem>>, %arg7: memref<2x9x15xf32, #tpu.memory_space<vmem>>, %arg8: memref<2x3x15xf32, #tpu.memory_space<vmem>>, %arg9: memref<1x1xf32, #tpu.memory_space<smem>>, %arg10: memref<8x256xf32, #tpu.memory_space<vmem>>, %arg11: memref<8x256xf32, #tpu.memory_space<vmem>>) attributes {dimension_semantics = [#tpu.dimension_semantics<arbitrary>], iteration_bounds = array<i64: 2>, scalar_prefetch = 0 : i64, scratch_operands = 2 : i64, tpu.core_type = #tpu.core_type<tc>, window_params = [{pipeline_mode = #tpu.pipeline_mode<synchronous>, transform_indices = @transform_0, window_bounds = array<i64: 4, 256>}, {transform_indices = @transform_1, window_bounds = array<i64: 1, 24, 4>}, {transform_indices = @transform_2, window_bounds = array<i64: 2, 8, 256>}, {transform_indices = @transform_3, window_bounds = array<i64: 8, 256>}, {pipeline_mode = #tpu.pipeline_mode<synchronous>, transform_indices = @transform_4, window_bounds = array<i64: 2, 9, 15>}, {pipeline_mode = #tpu.pipeline_mode<synchronous>, transform_indices = @transform_5, window_bounds = array<i64: 2, 3, 15>}, {pipeline_mode = #tpu.pipeline_mode<synchronous>, transform_indices = @transform_6, window_bounds = array<i64: 2, 9, 15>}, {pipeline_mode = #tpu.pipeline_mode<synchronous>, transform_indices = @transform_7, window_bounds = array<i64: 2, 3, 15>}, {transform_indices = @transform_8, window_bounds = array<i64: 1, 1>}]} {
    %c0_i32 = arith.constant 0 : i32
    %0 = arith.cmpi eq, %arg0, %c0_i32 : i32
    %1 = arith.extui %0 : i1 to i32
    %c0_i32_0 = arith.constant 0 : i32
    %2 = arith.cmpi ne, %1, %c0_i32_0 : i32
    scf.if %2 {
      %cst_25 = arith.constant 0.000000e+00 : f32
      %43 = vector.broadcast %cst_25 : f32 to vector<8x256xf32>
      %c0_26 = arith.constant 0 : index
      %c0_27 = arith.constant 0 : index
      %44 = vector.load %arg10[%c0_26, %c0_27] : memref<8x256xf32, #tpu.memory_space<vmem>>, vector<8x256xf32>
      tpu.vector_store %arg10[%c0_26, %c0_27], %43 {strides = array<i32>} : memref<8x256xf32, #tpu.memory_space<vmem>>, vector<8x256xf32>,
      %cst_28 = arith.constant 0.000000e+00 : f32
      %45 = vector.broadcast %cst_28 : f32 to vector<8x256xf32>
      %c0_29 = arith.constant 0 : index
      %c0_30 = arith.constant 0 : index
      %46 = vector.load %arg11[%c0_29, %c0_30] : memref<8x256xf32, #tpu.memory_space<vmem>>, vector<8x256xf32>
      tpu.vector_store %arg11[%c0_29, %c0_30], %45 {strides = array<i32>} : memref<8x256xf32, #tpu.memory_space<vmem>>, vector<8x256xf32>,
    } else {
    }
    %c0 = arith.constant 0 : index
    %c0_1 = arith.constant 0 : index
    %3 = vector.load %arg1[%c0, %c0_1] : memref<4x256xf32, #tpu.memory_space<vmem>>, vector<4x256xf32>
    %c0_2 = arith.constant 0 : index
    %c0_3 = arith.constant 0 : index
    %c0_4 = arith.constant 0 : index
    %4 = vector.load %arg2[%c0_2, %c0_3, %c0_4] : memref<1x24x4xf32, #tpu.memory_space<vmem>>, vector<1x24x4xf32>
    %5 = vector.shape_cast %4 : vector<1x24x4xf32> to vector<24x4xf32>
    %cst = arith.constant dense<0.000000e+00> : vector<24x256xf32>
    %6 = tpu.matmul %5, %3, %cst {dimension_numbers = #tpu.dot_dimension_numbers<[1], [0], [0], [1], [0, 0, 1, 1], [], []>} : vector<24x4xf32>, vector<4x256xf32>, vector<24x256xf32> -> vector<24x256xf32>
    %7 = vector.extract_strided_slice %6 {offsets = [0, 0], sizes = [8, 256], strides = [1, 1]} : vector<24x256xf32> to vector<8x256xf32>
    %8 = vector.extract_strided_slice %6 {offsets = [8, 0], sizes = [8, 256], strides = [1, 1]} : vector<24x256xf32> to vector<8x256xf32>
    %9 = vector.extract_strided_slice %6 {offsets = [16, 0], sizes = [8, 256], strides = [1, 1]} : vector<24x256xf32> to vector<8x256xf32>
    %cst_5 = arith.constant 9.99999974E-5 : f32
    %10 = vector.broadcast %cst_5 : f32 to vector<8x256xf32>
    %11 = arith.cmpf ogt, %9, %10 : vector<8x256xf32>
    %cst_6 = arith.constant 9.99999974E-5 : f32
    %12 = vector.broadcast %cst_6 : f32 to vector<8x256xf32>
    %13 = arith.subf %12, %9 : vector<8x256xf32>
    %cst_7 = arith.constant 1.000000e+00 : f32
    %14 = vector.broadcast %cst_7 : f32 to vector<8x256xf32>
    %15 = arith.mulf %13, %14 : vector<8x256xf32>
    %cst_8 = arith.constant 1.000000e+00 : f32
    %16 = vector.broadcast %cst_8 : f32 to vector<8x256xf32>
    %17 = arith.select %11, %9, %16 : vector<8x256xi1>, vector<8x256xf32>
    %18 = tpu.reciprocal %17 : vector<8x256xf32> -> vector<8x256xf32>
    %19 = arith.mulf %7, %18 : vector<8x256xf32>
    %c0_9 = arith.constant 0 : index
    %c0_10 = arith.constant 0 : index
    %c0_11 = arith.constant 0 : index
    %20 = vector.load %arg3[%c0_9, %c0_10, %c0_11] : memref<2x8x256xf32, #tpu.memory_space<vmem>>, vector<1x8x256xf32>
    %21 = vector.shape_cast %20 : vector<1x8x256xf32> to vector<8x256xf32>
    %22 = arith.subf %19, %21 : vector<8x256xf32>
    %23 = arith.mulf %8, %18 : vector<8x256xf32>
    %c1 = arith.constant 1 : index
    %c0_12 = arith.constant 0 : index
    %c0_13 = arith.constant 0 : index
    %24 = vector.load %arg3[%c1, %c0_12, %c0_13] : memref<2x8x256xf32, #tpu.memory_space<vmem>>, vector<1x8x256xf32>
    %25 = vector.shape_cast %24 : vector<1x8x256xf32> to vector<8x256xf32>
    %26 = arith.subf %23, %25 : vector<8x256xf32>
    %27 = arith.mulf %22, %22 : vector<8x256xf32>
    %28 = arith.mulf %26, %26 : vector<8x256xf32>
    %29 = arith.addf %27, %28 : vector<8x256xf32>
    %30 = math.sqrt %29 : vector<8x256xf32>
    %31 = arith.select %11, %30, %15 : vector<8x256xi1>, vector<8x256xf32>
    %c0_14 = arith.constant 0 : index
    %c0_15 = arith.constant 0 : index
    %32 = vector.load %arg4[%c0_14, %c0_15] : memref<8x256xf32, #tpu.memory_space<vmem>>, vector<8x256xf32>
    %c0_16 = arith.constant 0 : index
    %c0_17 = arith.constant 0 : index
    %33 = vector.load %arg10[%c0_16, %c0_17] : memref<8x256xf32, #tpu.memory_space<vmem>>, vector<8x256xf32>
    %34 = arith.mulf %31, %32 : vector<8x256xf32>
    %35 = arith.addf %33, %34 : vector<8x256xf32>
    %c0_18 = arith.constant 0 : index
    %c0_19 = arith.constant 0 : index
    %36 = vector.load %arg10[%c0_18, %c0_19] : memref<8x256xf32, #tpu.memory_space<vmem>>, vector<8x256xf32>
    tpu.vector_store %arg10[%c0_18, %c0_19], %35 {strides = array<i32>} : memref<8x256xf32, #tpu.memory_space<vmem>>, vector<8x256xf32>,
    %c0_20 = arith.constant 0 : index
    %c0_21 = arith.constant 0 : index
    %37 = vector.load %arg11[%c0_20, %c0_21] : memref<8x256xf32, #tpu.memory_space<vmem>>, vector<8x256xf32>
    %38 = arith.addf %37, %32 : vector<8x256xf32>
    %c0_22 = arith.constant 0 : index
    %c0_23 = arith.constant 0 : index
    %39 = vector.load %arg11[%c0_22, %c0_23] : memref<8x256xf32, #tpu.memory_space<vmem>>, vector<8x256xf32>
    tpu.vector_store %arg11[%c0_22, %c0_23], %38 {strides = array<i32>} : memref<8x256xf32, #tpu.memory_space<vmem>>, vector<8x256xf32>,
    %c1_i32 = arith.constant 1 : i32
    %40 = arith.cmpi eq, %arg0, %c1_i32 : i32
    %41 = arith.extui %40 : i1 to i32
    %c0_i32_24 = arith.constant 0 : i32
    %42 = arith.cmpi ne, %41, %c0_i32_24 : i32
    scf.if %42 {
      %c0_25 = arith.constant 0 : index
      %c0_26 = arith.constant 0 : index
      %43 = vector.load %arg10[%c0_25, %c0_26] : memref<8x256xf32, #tpu.memory_space<vmem>>, vector<8x256xf32>
      %44 = vector.shape_cast %43 : vector<8x256xf32> to vector<1x8x256xf32>
      %cst_27 = arith.constant dense<0.000000e+00> : vector<1xf32>
      %45 = vector.multi_reduction <add>, %44, %cst_27 [1, 2] : vector<1x8x256xf32> to vector<1xf32>
      %46 = vector.shape_cast %45 : vector<1xf32> to vector<1x1x1xf32>
      %47 = vector.extract %46[0, 0, 0] : f32 from vector<1x1x1xf32>
      %c0_28 = arith.constant 0 : index
      %c0_29 = arith.constant 0 : index
      %48 = vector.load %arg11[%c0_28, %c0_29] : memref<8x256xf32, #tpu.memory_space<vmem>>, vector<8x256xf32>
      %49 = vector.shape_cast %48 : vector<8x256xf32> to vector<1x8x256xf32>
      %cst_30 = arith.constant dense<0.000000e+00> : vector<1xf32>
      %50 = vector.multi_reduction <add>, %49, %cst_30 [1, 2] : vector<1x8x256xf32> to vector<1xf32>
      %51 = vector.shape_cast %50 : vector<1xf32> to vector<1x1x1xf32>
      %52 = vector.extract %51[0, 0, 0] : f32 from vector<1x1x1xf32>
      %c0_31 = arith.constant 0 : index
      %c0_32 = arith.constant 0 : index
      %c0_33 = arith.constant 0 : index
      %53 = vector.load %arg5[%c0_31, %c0_32, %c0_33] : memref<2x9x15xf32, #tpu.memory_space<vmem>>, vector<2x1x15xf32>
      %c0_34 = arith.constant 0 : index
      %c1_35 = arith.constant 1 : index
      %c0_36 = arith.constant 0 : index
      %54 = vector.load %arg5[%c0_34, %c1_35, %c0_36] : memref<2x9x15xf32, #tpu.memory_space<vmem>>, vector<2x1x15xf32>
      %c0_37 = arith.constant 0 : index
      %c2 = arith.constant 2 : index
      %c0_38 = arith.constant 0 : index
      %55 = vector.load %arg5[%c0_37, %c2, %c0_38] : memref<2x9x15xf32, #tpu.memory_space<vmem>>, vector<2x1x15xf32>
      %c0_39 = arith.constant 0 : index
      %c3 = arith.constant 3 : index
      %c0_40 = arith.constant 0 : index
      %56 = vector.load %arg5[%c0_39, %c3, %c0_40] : memref<2x9x15xf32, #tpu.memory_space<vmem>>, vector<2x1x15xf32>
      %c0_41 = arith.constant 0 : index
      %c4 = arith.constant 4 : index
      %c0_42 = arith.constant 0 : index
      %57 = vector.load %arg5[%c0_41, %c4, %c0_42] : memref<2x9x15xf32, #tpu.memory_space<vmem>>, vector<2x1x15xf32>
      %c0_43 = arith.constant 0 : index
      %c5 = arith.constant 5 : index
      %c0_44 = arith.constant 0 : index
      %58 = vector.load %arg5[%c0_43, %c5, %c0_44] : memref<2x9x15xf32, #tpu.memory_space<vmem>>, vector<2x1x15xf32>
      %c0_45 = arith.constant 0 : index
      %c6 = arith.constant 6 : index
      %c0_46 = arith.constant 0 : index
      %59 = vector.load %arg5[%c0_45, %c6, %c0_46] : memref<2x9x15xf32, #tpu.memory_space<vmem>>, vector<2x1x15xf32>
      %c0_47 = arith.constant 0 : index
      %c7 = arith.constant 7 : index
      %c0_48 = arith.constant 0 : index
      %60 = vector.load %arg5[%c0_47, %c7, %c0_48] : memref<2x9x15xf32, #tpu.memory_space<vmem>>, vector<2x1x15xf32>
      %c0_49 = arith.constant 0 : index
      %c8 = arith.constant 8 : index
      %c0_50 = arith.constant 0 : index
      %61 = vector.load %arg5[%c0_49, %c8, %c0_50] : memref<2x9x15xf32, #tpu.memory_space<vmem>>, vector<2x1x15xf32>
      %c0_51 = arith.constant 0 : index
      %c0_52 = arith.constant 0 : index
      %c0_53 = arith.constant 0 : index
      %62 = vector.load %arg6[%c0_51, %c0_52, %c0_53] : memref<2x3x15xf32, #tpu.memory_space<vmem>>, vector<2x1x15xf32>
      %c0_54 = arith.constant 0 : index
      %c1_55 = arith.constant 1 : index
      %c0_56 = arith.constant 0 : index
      %63 = vector.load %arg6[%c0_54, %c1_55, %c0_56] : memref<2x3x15xf32, #tpu.memory_space<vmem>>, vector<2x1x15xf32>
      %c0_57 = arith.constant 0 : index
      %c2_58 = arith.constant 2 : index
      %c0_59 = arith.constant 0 : index
      %64 = vector.load %arg6[%c0_57, %c2_58, %c0_59] : memref<2x3x15xf32, #tpu.memory_space<vmem>>, vector<2x1x15xf32>
      %65 = arith.mulf %57, %61 : vector<2x1x15xf32>
      %66 = arith.mulf %58, %60 : vector<2x1x15xf32>
      %67 = arith.subf %65, %66 : vector<2x1x15xf32>
      %68 = arith.mulf %53, %67 : vector<2x1x15xf32>
      %69 = arith.mulf %58, %59 : vector<2x1x15xf32>
      %70 = arith.mulf %56, %61 : vector<2x1x15xf32>
      %71 = arith.subf %69, %70 : vector<2x1x15xf32>
      %72 = arith.mulf %54, %71 : vector<2x1x15xf32>
      %73 = arith.addf %68, %72 : vector<2x1x15xf32>
      %74 = arith.mulf %56, %60 : vector<2x1x15xf32>
      %75 = arith.mulf %57, %59 : vector<2x1x15xf32>
      %76 = arith.subf %74, %75 : vector<2x1x15xf32>
      %77 = arith.mulf %55, %76 : vector<2x1x15xf32>
      %78 = arith.addf %73, %77 : vector<2x1x15xf32>
      %79 = tpu.reciprocal %78 : vector<2x1x15xf32> -> vector<2x1x15xf32>
      %80 = arith.mulf %57, %61 : vector<2x1x15xf32>
      %81 = arith.mulf %58, %60 : vector<2x1x15xf32>
      %82 = arith.subf %80, %81 : vector<2x1x15xf32>
      %83 = arith.mulf %82, %62 : vector<2x1x15xf32>
      %84 = arith.mulf %55, %60 : vector<2x1x15xf32>
      %85 = arith.mulf %54, %61 : vector<2x1x15xf32>
      %86 = arith.subf %84, %85 : vector<2x1x15xf32>
      %87 = arith.mulf %86, %63 : vector<2x1x15xf32>
      %88 = arith.addf %83, %87 : vector<2x1x15xf32>
      %89 = arith.mulf %54, %58 : vector<2x1x15xf32>
      %90 = arith.mulf %55, %57 : vector<2x1x15xf32>
      %91 = arith.subf %89, %90 : vector<2x1x15xf32>
      %92 = arith.mulf %91, %64 : vector<2x1x15xf32>
      %93 = arith.addf %88, %92 : vector<2x1x15xf32>
      %cst_60 = arith.constant 0.000000e+00 : f32
      %94 = vector.broadcast %cst_60 : f32 to vector<2x1x15xf32>
      %95 = arith.subf %94, %93 : vector<2x1x15xf32>
      %96 = arith.mulf %95, %79 : vector<2x1x15xf32>
      %97 = arith.mulf %58, %59 : vector<2x1x15xf32>
      %98 = arith.mulf %56, %61 : vector<2x1x15xf32>
      %99 = arith.subf %97, %98 : vector<2x1x15xf32>
      %100 = arith.mulf %99, %62 : vector<2x1x15xf32>
      %101 = arith.mulf %53, %61 : vector<2x1x15xf32>
      %102 = arith.mulf %55, %59 : vector<2x1x15xf32>
      %103 = arith.subf %101, %102 : vector<2x1x15xf32>
      %104 = arith.mulf %103, %63 : vector<2x1x15xf32>
      %105 = arith.addf %100, %104 : vector<2x1x15xf32>
      %106 = arith.mulf %55, %56 : vector<2x1x15xf32>
      %107 = arith.mulf %53, %58 : vector<2x1x15xf32>
      %108 = arith.subf %106, %107 : vector<2x1x15xf32>
      %109 = arith.mulf %108, %64 : vector<2x1x15xf32>
      %110 = arith.addf %105, %109 : vector<2x1x15xf32>
      %cst_61 = arith.constant 0.000000e+00 : f32
      %111 = vector.broadcast %cst_61 : f32 to vector<2x1x15xf32>
      %112 = arith.subf %111, %110 : vector<2x1x15xf32>
      %113 = arith.mulf %112, %79 : vector<2x1x15xf32>
      %114 = arith.mulf %56, %60 : vector<2x1x15xf32>
      %115 = arith.mulf %57, %59 : vector<2x1x15xf32>
      %116 = arith.subf %114, %115 : vector<2x1x15xf32>
      %117 = arith.mulf %116, %62 : vector<2x1x15xf32>
      %118 = arith.mulf %54, %59 : vector<2x1x15xf32>
      %119 = arith.mulf %53, %60 : vector<2x1x15xf32>
      %120 = arith.subf %118, %119 : vector<2x1x15xf32>
      %121 = arith.mulf %120, %63 : vector<2x1x15xf32>
      %122 = arith.addf %117, %121 : vector<2x1x15xf32>
      %123 = arith.mulf %53, %57 : vector<2x1x15xf32>
      %124 = arith.mulf %54, %56 : vector<2x1x15xf32>
      %125 = arith.subf %123, %124 : vector<2x1x15xf32>
      %126 = arith.mulf %125, %64 : vector<2x1x15xf32>
      %127 = arith.addf %122, %126 : vector<2x1x15xf32>
      %cst_62 = arith.constant 0.000000e+00 : f32
      %128 = vector.broadcast %cst_62 : f32 to vector<2x1x15xf32>
      %129 = arith.subf %128, %127 : vector<2x1x15xf32>
      %130 = arith.mulf %129, %79 : vector<2x1x15xf32>
      %c0_63 = arith.constant 0 : index
      %c0_64 = arith.constant 0 : index
      %c0_65 = arith.constant 0 : index
      %131 = vector.load %arg8[%c0_63, %c0_64, %c0_65] : memref<2x3x15xf32, #tpu.memory_space<vmem>>, vector<2x1x15xf32>
      %c0_66 = arith.constant 0 : index
      %c1_67 = arith.constant 1 : index
      %c0_68 = arith.constant 0 : index
      %132 = vector.load %arg8[%c0_66, %c1_67, %c0_68] : memref<2x3x15xf32, #tpu.memory_space<vmem>>, vector<2x1x15xf32>
      %c0_69 = arith.constant 0 : index
      %c2_70 = arith.constant 2 : index
      %c0_71 = arith.constant 0 : index
      %133 = vector.load %arg8[%c0_69, %c2_70, %c0_71] : memref<2x3x15xf32, #tpu.memory_space<vmem>>, vector<2x1x15xf32>
      %c0_72 = arith.constant 0 : index
      %c0_73 = arith.constant 0 : index
      %c0_74 = arith.constant 0 : index
      %134 = vector.load %arg7[%c0_72, %c0_73, %c0_74] : memref<2x9x15xf32, #tpu.memory_space<vmem>>, vector<2x1x15xf32>
      %135 = arith.mulf %134, %131 : vector<2x1x15xf32>
      %c0_75 = arith.constant 0 : index
      %c3_76 = arith.constant 3 : index
      %c0_77 = arith.constant 0 : index
      %136 = vector.load %arg7[%c0_75, %c3_76, %c0_77] : memref<2x9x15xf32, #tpu.memory_space<vmem>>, vector<2x1x15xf32>
      %137 = arith.mulf %136, %132 : vector<2x1x15xf32>
      %138 = arith.addf %135, %137 : vector<2x1x15xf32>
      %c0_78 = arith.constant 0 : index
      %c6_79 = arith.constant 6 : index
      %c0_80 = arith.constant 0 : index
      %139 = vector.load %arg7[%c0_78, %c6_79, %c0_80] : memref<2x9x15xf32, #tpu.memory_space<vmem>>, vector<2x1x15xf32>
      %140 = arith.mulf %139, %133 : vector<2x1x15xf32>
      %141 = arith.addf %138, %140 : vector<2x1x15xf32>
      %142 = arith.addf %96, %141 : vector<2x1x15xf32>
      %c0_81 = arith.constant 0 : index
      %c1_82 = arith.constant 1 : index
      %c0_83 = arith.constant 0 : index
      %143 = vector.load %arg7[%c0_81, %c1_82, %c0_83] : memref<2x9x15xf32, #tpu.memory_space<vmem>>, vector<2x1x15xf32>
      %144 = arith.mulf %143, %131 : vector<2x1x15xf32>
      %c0_84 = arith.constant 0 : index
      %c4_85 = arith.constant 4 : index
      %c0_86 = arith.constant 0 : index
      %145 = vector.load %arg7[%c0_84, %c4_85, %c0_86] : memref<2x9x15xf32, #tpu.memory_space<vmem>>, vector<2x1x15xf32>
      %146 = arith.mulf %145, %132 : vector<2x1x15xf32>
      %147 = arith.addf %144, %146 : vector<2x1x15xf32>
      %c0_87 = arith.constant 0 : index
      %c7_88 = arith.constant 7 : index
      %c0_89 = arith.constant 0 : index
      %148 = vector.load %arg7[%c0_87, %c7_88, %c0_89] : memref<2x9x15xf32, #tpu.memory_space<vmem>>, vector<2x1x15xf32>
      %149 = arith.mulf %148, %133 : vector<2x1x15xf32>
      %150 = arith.addf %147, %149 : vector<2x1x15xf32>
      %151 = arith.addf %113, %150 : vector<2x1x15xf32>
      %c0_90 = arith.constant 0 : index
      %c2_91 = arith.constant 2 : index
      %c0_92 = arith.constant 0 : index
      %152 = vector.load %arg7[%c0_90, %c2_91, %c0_92] : memref<2x9x15xf32, #tpu.memory_space<vmem>>, vector<2x1x15xf32>
      %153 = arith.mulf %152, %131 : vector<2x1x15xf32>
      %c0_93 = arith.constant 0 : index
      %c5_94 = arith.constant 5 : index
      %c0_95 = arith.constant 0 : index
      %154 = vector.load %arg7[%c0_93, %c5_94, %c0_95] : memref<2x9x15xf32, #tpu.memory_space<vmem>>, vector<2x1x15xf32>
      %155 = arith.mulf %154, %132 : vector<2x1x15xf32>
      %156 = arith.addf %153, %155 : vector<2x1x15xf32>
      %c0_96 = arith.constant 0 : index
      %c8_97 = arith.constant 8 : index
      %c0_98 = arith.constant 0 : index
      %157 = vector.load %arg7[%c0_96, %c8_97, %c0_98] : memref<2x9x15xf32, #tpu.memory_space<vmem>>, vector<2x1x15xf32>
      %158 = arith.mulf %157, %133 : vector<2x1x15xf32>
      %159 = arith.addf %156, %158 : vector<2x1x15xf32>
      %160 = arith.addf %130, %159 : vector<2x1x15xf32>
      %161 = vector.extract_strided_slice %142 {offsets = [1, 0, 0], sizes = [1, 1, 15], strides = [1, 1, 1]} : vector<2x1x15xf32> to vector<1x1x15xf32>
      %162 = vector.shape_cast %161 : vector<1x1x15xf32> to vector<1x15xf32>
      %163 = vector.extract_strided_slice %142 {offsets = [0, 0, 0], sizes = [1, 1, 15], strides = [1, 1, 1]} : vector<2x1x15xf32> to vector<1x1x15xf32>
      %164 = vector.shape_cast %163 : vector<1x1x15xf32> to vector<1x15xf32>
      %165 = arith.subf %162, %164 : vector<1x15xf32>
      %166 = vector.extract_strided_slice %151 {offsets = [1, 0, 0], sizes = [1, 1, 15], strides = [1, 1, 1]} : vector<2x1x15xf32> to vector<1x1x15xf32>
      %167 = vector.shape_cast %166 : vector<1x1x15xf32> to vector<1x15xf32>
      %168 = vector.extract_strided_slice %151 {offsets = [0, 0, 0], sizes = [1, 1, 15], strides = [1, 1, 1]} : vector<2x1x15xf32> to vector<1x1x15xf32>
      %169 = vector.shape_cast %168 : vector<1x1x15xf32> to vector<1x15xf32>
      %170 = arith.subf %167, %169 : vector<1x15xf32>
      %171 = vector.extract_strided_slice %160 {offsets = [1, 0, 0], sizes = [1, 1, 15], strides = [1, 1, 1]} : vector<2x1x15xf32> to vector<1x1x15xf32>
      %172 = vector.shape_cast %171 : vector<1x1x15xf32> to vector<1x15xf32>
      %173 = vector.extract_strided_slice %160 {offsets = [0, 0, 0], sizes = [1, 1, 15], strides = [1, 1, 1]} : vector<2x1x15xf32> to vector<1x1x15xf32>
      %174 = vector.shape_cast %173 : vector<1x1x15xf32> to vector<1x15xf32>
      %175 = arith.subf %172, %174 : vector<1x15xf32>
      %176 = arith.mulf %165, %165 : vector<1x15xf32>
      %177 = arith.mulf %170, %170 : vector<1x15xf32>
      %178 = arith.addf %176, %177 : vector<1x15xf32>
      %179 = arith.mulf %175, %175 : vector<1x15xf32>
      %180 = arith.addf %178, %179 : vector<1x15xf32>
      %181 = math.sqrt %180 : vector<1x15xf32>
      %182 = vector.shape_cast %181 : vector<1x15xf32> to vector<1x1x15xf32>
      %cst_99 = arith.constant dense<0.000000e+00> : vector<1xf32>
      %183 = vector.multi_reduction <add>, %182, %cst_99 [1, 2] : vector<1x1x15xf32> to vector<1xf32>
      %184 = vector.shape_cast %183 : vector<1xf32> to vector<1x1x1xf32>
      %185 = vector.extract %184[0, 0, 0] : f32 from vector<1x1x1xf32>
      %cst_100 = arith.constant 1.500000e+01 : f32
      %186 = arith.divf %185, %cst_100 : f32
      %187 = arith.divf %47, %52 : f32
      %188 = arith.addf %186, %187 : f32
      %c0_101 = arith.constant 0 : index
      %c0_102 = arith.constant 0 : index
      %189 = memref.load %arg9[%c0_101, %c0_102] : memref<1x1xf32, #tpu.memory_space<smem>>
      memref.store %188, %arg9[%c0_101, %c0_102] : memref<1x1xf32, #tpu.memory_space<smem>>
    } else {
    }
    return
  }
  func.func @transform_0(%arg0: i32) -> (i32, i32) {
    %c0_i32 = arith.constant 0 : i32
    %c0_i32_0 = arith.constant 0 : i32
    %c0_i32_1 = arith.constant 0 : i32
    return %c0_i32, %c0_i32_0 : i32, i32
  }
  func.func @transform_1(%arg0: i32) -> (i32, i32, i32) {
    %c0_i32 = arith.constant 0 : i32
    %c0_i32_0 = arith.constant 0 : i32
    %c0_i32_1 = arith.constant 0 : i32
    return %arg0, %c0_i32, %c0_i32_0 : i32, i32, i32
  }
  func.func @transform_2(%arg0: i32) -> (i32, i32, i32) {
    %c0_i32 = arith.constant 0 : i32
    %c0_i32_0 = arith.constant 0 : i32
    %c0_i32_1 = arith.constant 0 : i32
    return %c0_i32, %arg0, %c0_i32_0 : i32, i32, i32
  }
  func.func @transform_3(%arg0: i32) -> (i32, i32) {
    %c0_i32 = arith.constant 0 : i32
    %c0_i32_0 = arith.constant 0 : i32
    return %arg0, %c0_i32 : i32, i32
  }
  func.func @transform_4(%arg0: i32) -> (i32, i32, i32) {
    %c0_i32 = arith.constant 0 : i32
    %c0_i32_0 = arith.constant 0 : i32
    %c0_i32_1 = arith.constant 0 : i32
    %c0_i32_2 = arith.constant 0 : i32
    return %c0_i32, %c0_i32_0, %c0_i32_1 : i32, i32, i32
  }
  func.func @transform_5(%arg0: i32) -> (i32, i32, i32) {
    %c0_i32 = arith.constant 0 : i32
    %c0_i32_0 = arith.constant 0 : i32
    %c0_i32_1 = arith.constant 0 : i32
    %c0_i32_2 = arith.constant 0 : i32
    return %c0_i32, %c0_i32_0, %c0_i32_1 : i32, i32, i32
  }
  func.func @transform_6(%arg0: i32) -> (i32, i32, i32) {
    %c0_i32 = arith.constant 0 : i32
    %c0_i32_0 = arith.constant 0 : i32
    %c0_i32_1 = arith.constant 0 : i32
    %c0_i32_2 = arith.constant 0 : i32
    return %c0_i32, %c0_i32_0, %c0_i32_1 : i32, i32, i32
  }
  func.func @transform_7(%arg0: i32) -> (i32, i32, i32) {
    %c0_i32 = arith.constant 0 : i32
    %c0_i32_0 = arith.constant 0 : i32
    %c0_i32_1 = arith.constant 0 : i32
    %c0_i32_2 = arith.constant 0 : i32
    return %c0_i32, %c0_i32_0, %c0_i32_1 : i32, i32, i32
  }
  func.func @transform_8(%arg0: i32) -> (i32, i32) {
    %c0_i32 = arith.constant 0 : i32
    %c0_i32_0 = arith.constant 0 : i32
    %c0_i32_1 = arith.constant 0 : i32
    return %c0_i32, %c0_i32_0 : i32, i32
  }
}

</mosaic_0001>

<bundles_post_ra>
// kernel: combined_loss.1
= control target key start
LH: loop header
LB: loop body
LE: loop exit
PB: predicated region body
PF: predicated region fallthrough
CT: control target
= control target key end

     0   :  { %13 = vsyncpa [#allocation6], 0  ;;  %s1102_s27 = smov 0   ;;  %s1104_s28 = smov 0   ;;  %s1537_s0 = inlined_call_operand.vmem [shape: f32[4,256], index: 0, kind: input, shape index: {}]   ;;  %s1538_s1 = inlined_call_operand.vmem [shape: f32[2,24,4], index: 1, kind: input, shape index: {}]   ;;  %s1539_s2 = inlined_call_operand.vmem [shape: f32[2,16,256], index: 2, kind: input, shape index: {}]   ;;  %s1540_s3 = inlined_call_operand.vmem [shape: f32[16,256], index: 3, kind: input, shape index: {}]   ;;  %s1541_s4 = inlined_call_operand.vmem [shape: f32[2,9,15], index: 4, kind: input, shape index: {}]   ;;  %s1542_s5 = inlined_call_operand.vmem [shape: f32[2,3,15], index: 5, kind: input, shape index: {}]   ;;  %s1543_s6 = inlined_call_operand.vmem [shape: f32[2,9,15], index: 6, kind: input, shape index: {}]   ;;  %s1544_s7 = inlined_call_operand.vmem [shape: f32[2,3,15], index: 7, kind: input, shape index: {}]   ;;  %s1545_s8 = inlined_call_operand.hbm [shape: f32[1,1], index: 8, kind: output, shape index: {}]  }
   0x1   :  { %s1106_s29 = smov 0  }
   0x2 LB: > { %s1118_s30 = sadd.s32 4294967295, %s1052_s29   ;;  %s1121_s9 = sadd.s32 1, %s1052_s29   ;;  %s1052_s29 = sphi %s1106_s29, %s1556_s29   ;;  %s1048_s28 = sphi %s1104_s28, %s1555_s28   ;;  %s1044_s27 = sphi %s1102_s27, %s1554_s27  }
   0x3   : > { %s70_s10 = ssub.s32 %s1052_s29, %s1121_s9  ;;  %s73_s11 = sadd.s32 1, %s1048_s28 }
   0x4   : > { %p71_p0 = scmp.eq.s32.totalorder %s70_s10, 0  ;;  %p80_p1 = scmp.ne.s32.totalorder %s1048_s28, %s1044_s27 }
   0x5   : > { %p81_p2 = scmp.eq.s32.totalorder %s1052_s29, 0  ;;  %p921_p4 = scmp.ge.s32.totalorder %s1052_s29, 2 }
   0x6   : > { %s1130_s12 = scalar_select %p71_p0, %s1048_s28, %s73_s11  }
   0x7   : > { %p82_p3 = por %p81_p2, %p80_p1  ;;  %252 = sbr.rel (%p921_p4) target bundleno = 20 (0x14), region = 36 }
   0xc   : > { %263 = sbr.rel (!%p82_p3) target bundleno = 20 (0x14), region = 44  ;;  %s265_s13 = sand.u32 (%p82_p3), 1, %s1048_s28  }
   0xd   : > { %s946_s14 = sshll.u32 (%p82_p3), %s1052_s29, 4  ;;  %s922_s15 = sshll.u32 (%p82_p3), %s265_s13, 5 }
   0xe   : > { %s270_s18 = scalar_lea.vmem (%p82_p3), %s1539_s2, %s946_s14  ;;  %s267_s19 = scalar_lea.vmem (%p82_p3), [#allocation4], %s922_s15 }
   0xf   : > { %v283_v0 = vld [vmem:[%s270_s18] sm:$0xff] (%p82_p3)  ;;  %v285_v1 = vld [vmem:[%s270_s18 + $0x8] sm:$0xff] (%p82_p3) }
  0x10   : > { %v287_v2 = vld [vmem:[%s270_s18 + $0x20] sm:$0xff] (%p82_p3)  ;;  %284 = vst [vmem:[%s267_s19] sm:$0xff] (%p82_p3), %v283_v0  ;;  %v289_v3 = vld [vmem:[%s270_s18 + $0x28] sm:$0xff] (%p82_p3) }
  0x11   : > { %286 = vst [vmem:[%s267_s19 + $0x8] sm:$0xff] %v285_v1 }
  0x12   : > { %288 = vst [vmem:[%s267_s19 + $0x10] sm:$0xff] %v287_v2 }
  0x13   : > { %290 = vst [vmem:[%s267_s19 + $0x18] sm:$0xff] %v289_v3 }
  0x14 PF: > { %p925_p5 = scmp.ge.s32.totalorder %s1052_s29, 1  ;;  %p303_p6 = scmp.lt.s32.totalorder %s1052_s29, 3 }
  0x16   : > { %p304_p7 = pnand %p925_p5, %p303_p6 }
  0x17   : > { %s310_s20 = sand.u32 (!%p304_p7), 1, %s1044_s27   ;;  %p348_p8 = scmp.lt.s32.totalorder (!%p304_p7), %s1118_s30, 1 }
  0x18   : > { %307 = sbr.rel (%p304_p7) target bundleno = 519 (0x207), region = 71  ;;  %s926_s21 = sshll.u32 (!%p304_p7), %s310_s20, 5 }
  0x19   : > { %s1151_s14 = scalar_lea.vmem (!%p304_p7), [#allocation4], %s926_s21  ;;  %p930_p9 = scmp.ne.s32.totalorder (!%p304_p7), %s1118_s30, 0 }
  0x1d   : > { %s349_s22 = scalar_select %p348_p8, %s1118_s30, 1 }
  0x1e   : > { %361 = sbr.rel (%p930_p9) target bundleno = 40 (0x28), region = 79 }
  0x1f   : > { %s950_s23 = smul.u32 24, %s349_s22  ;;  %s947_s24 = sshll.u32 %s349_s22, 4 }
  0x20   : > { %s1146_s10 = scalar_lea.vmem %s1540_s3, %s947_s24 }
  0x21   : > { %s352_s29 = scalar_lea.vmem %s1538_s1, %s950_s23 }
  0x23   : > { %v1054_v4 = vmov 0.0  }
  0x24   : > { %362 = vst [vmem:[#allocation2] sm:$0xff] %v1054_v4 }
  0x25   : > { %363 = vst [vmem:[#allocation2 + $0x8] sm:$0xff] %v1054_v4 }
  0x26   : > { %364 = vst [vmem:[#allocation3 + $0x8] sm:$0xff] %v1054_v4 }
  0x27   : > { %365 = vst [vmem:[#allocation3] sm:$0xff] %v1054_v4 }
  0x28 PF: > { %v366_v5 = vld [vmem:[%s1537_s0] sm:$0xff]  ;;  %vm384_vm0 = vcmask 1043456   ;;  %v368_v6 = vld [vmem:[%s352_s29 + $0x8] sm:$0xff]  ;;  %vm374_vm1 = vcmask 31744   ;;  %v369_v10 = vld [vmem:[%s352_s29 + $0x10] sm:$0xff]  ;;  %p941_p10 = scmp.ne.s32.totalorder %s1118_s30, 1 }
  0x29   : > { %371 = vst [vmem:[#allocation1] ss:$2 sm:$0xff] %v366_v5  ;;  %v367_v9 = vld [vmem:[%s352_s29] sm:$0xff]  ;;  %v477_v34 = vld [vmem:[%s1151_s14] sm:$0xff]  ;;  %v939_v35 = vld [vmem:[%s1151_s14 + $0x10] sm:$0xff] }
  0x2a   : > { %v520_v39 = vld [vmem:[%s1146_s10] sm:$0xff]  ;;  %v478_v41 = vld [vmem:[%s1151_s14 + $0x8] sm:$0xff]  ;;  %v521_v47 = vld [vmem:[%s1146_s10 + $0x8] sm:$0xff] }
  0x2b   : > { %v940_v42 = vld [vmem:[%s1151_s14 + $0x18] sm:$0xff] }
  0x2d   : > { %v530_v45 = vld [vmem:[#allocation3 + $0x8] sm:$0xff] }
  0x2e   : > { %v531_v48 = vld [vmem:[#allocation3] sm:$0xff]  ;;  %v532_v49 = vadd.f32 %v530_v45, %v520_v39 }
  0x2f   : > { %v533_v52 = vadd.f32 %v531_v48, %v521_v47 }
  0x30   : > { %v372_v7 = vld.sshfl [vmem:[#allocation1] sm:$0xff pattern:$0x75316420]  ;;  %v373_v8 = vld.sshfl [vmem:[#allocation1 + $0x8] sm:$0xff pattern:$0x75316420] }
  0x31   : > { %948 = vmatpush.msk.msra.mxu2 %vm384_vm0, %v372_v7  ;;  %949 = vmatpush.msk.msra.mxu3 %vm384_vm0, %v373_v8  ;;  %534 = vst [vmem:[#allocation3 + $0x8] sm:$0xff] %v532_v49 }
  0x32   : > { %933 = vmatmul.msk.f32.vlgmr.msra.gmra.mxu2 %vm374_vm1, %v368_v6  ;;  %937 = vmatmul.msk.f32.vlgmr.msra.gmra.mxu3 %vm374_vm1, %v368_v6  ;;  %535 = vst [vmem:[#allocation3] sm:$0xff] %v533_v52 }
  0x33   : > { %931 = vmatpush.msk.msra.mxu0 %vm384_vm0, %v372_v7  ;;  %935 = vmatpush.msk.msra.mxu1 %vm384_vm0, %v373_v8 }
  0x34   : > { %932 = vmatmul.msk.f32.vlgmr.msra.gmra.mxu0 %vm374_vm1, %v367_v9  ;;  %936 = vmatmul.msk.f32.vlgmr.msra.gmra.mxu1 %vm374_vm1, %v367_v9 }
  0x3a   : > { %934 = vmatmul.msk.f32.gmra.mxu2 %vm374_vm1, %v369_v10  ;;  %938 = vmatmul.msk.f32.gmra.mxu3 %vm374_vm1, %v369_v10 }
  0xb1   : > { %v406_v30 = vpop.f32.mrf.mxu0  ;;  %v432_v36 = vpop.f32.mrf.mxu1 }
  0xb5   : > { %v409_v11 = vpop.f32.mrf.mxu2  ;;  %v435_v12 = vpop.f32.mrf.mxu3 }
  0xbd   : > { %v1157_v13 = vpop.f32.mrf.mxu2  ;;  %v1159_v14 = vpop.f32.mrf.mxu3 }
  0xbe   : > { %vm441_vm2 = vcmp.gt.f32.partialorder %v1157_v13, 0.0001  ;;  %vm442_vm3 = vcmp.gt.f32.partialorder %v1159_v14, 0.0001 }
  0xbf   : > { %v445_v15 = vsel %vm441_vm2, %v1157_v13, 1.0  ;;  %v446_v16 = vsel %vm442_vm3, %v1159_v14, 1.0 }
  0xc0   : > { %994 = vrcp.f32 %v445_v15  ;;  %v458_v23 = vand.u32 2147483648, %v445_v15  ;;  %v456_v25 = vand.u32 2147483647, %v445_v15  ;;  %v472_v26 = vand.u32 2147483648, %v446_v16 }
  0xc1   : > { %996 = vrcp.f32 %v446_v16  ;;  %v470_v28 = vand.u32 2147483647, %v446_v16  ;;  %vm452_vm6 = vweird.f32 %v445_v15  ;;  %vm466_vm8 = vweird.f32 %v446_v16 }
  0xc2   : > { %v459_v31 = vor.u32 1.1754944e-38, %v458_v23  ;;  %vm457_vm9 = vcmp.eq.f32.partialorder %v456_v25, 8.507059e+37  ;;  %v473_v37 = vor.u32 1.1754944e-38, %v472_v26  ;;  %v522_v23 = vld [vmem:[#allocation2] sm:$0xff] }
  0xc3   : > { %vm471_vm11 = vcmp.eq.f32.partialorder %v470_v28, 8.507059e+37 }
  0xc6   : > { %v995_v17 = vpop.eup %994 }
  0xc7   : > { %v997_v18 = vpop.eup %996  ;;  %v448_v19 = vmul.f32 %v995_v17, %v445_v15  ;;  %vm453_vm4 = vweird.f32 %v995_v17 }
  0xc8   : > { %v462_v20 = vmul.f32 %v997_v18, %v446_v16  ;;  %vm467_vm5 = vweird.f32 %v997_v18  ;;  %vm454_vm7 = vmor %vm452_vm6, %vm453_vm4 }
  0xc9   : > { %v449_v21 = vsub.f32 1.0, %v448_v19  ;;  %vm468_vm10 = vmor %vm466_vm8, %vm467_vm5  ;;  %v444_v19 = vsub.f32 0.0001, %v1159_v14 }
  0xca   : > { %v463_v22 = vsub.f32 1.0, %v462_v20 }
  0xcb   : > { %v450_v24 = vmul.f32 %v995_v17, %v449_v21 }
  0xcc   : > { %v464_v27 = vmul.f32 %v997_v18, %v463_v22 }
  0xcd   : > { %v451_v29 = vadd.f32 %v995_v17, %v450_v24 }
  0xce   : > { %v465_v32 = vadd.f32 %v997_v18, %v464_v27  ;;  %v523_v27 = vld [vmem:[#allocation2 + $0x8] sm:$0xff] }
  0xcf   : > { %v455_v33 = vsel %vm454_vm7, %v995_v17, %v451_v29 }
  0xd0   : > { %v460_v38 = vsel %vm457_vm9, %v459_v31, %v455_v33  ;;  %v469_v40 = vsel %vm468_vm10, %v997_v18, %v465_v32 }
  0xd1   : > { %v475_v43 = vmul.f32 %v460_v38, %v406_v30  ;;  %v481_v44 = vmul.f32 %v460_v38, %v409_v11  ;;  %v474_v46 = vsel %vm471_vm11, %v473_v37, %v469_v40 }
  0xd2   : > { %v476_v50 = vmul.f32 %v474_v46, %v432_v36  ;;  %v482_v51 = vmul.f32 %v474_v46, %v435_v12  ;;  %v443_v12 = vsub.f32 0.0001, %v1157_v13 }
  0xd3   : > { %v479_v53 = vsub.f32 %v475_v43, %v477_v34  ;;  %v486_v54 = vsub.f32 %v481_v44, %v939_v35 }
  0xd4   : > { %v480_v55 = vsub.f32 %v476_v50, %v478_v41  ;;  %v487_v56 = vsub.f32 %v482_v51, %v940_v42 }
  0xd5   : > { %v488_v57 = vmul.f32 %v479_v53, %v479_v53  ;;  %v490_v58 = vmul.f32 %v486_v54, %v486_v54 }
  0xd6   : > { %v489_v59 = vmul.f32 %v480_v55, %v480_v55  ;;  %v491_v60 = vmul.f32 %v487_v56, %v487_v56 }
  0xd7   : > { %v492_v61 = vadd.f32 %v490_v58, %v488_v57 }
  0xd8   : > { %v493_v62 = vadd.f32 %v491_v60, %v489_v59 }
  0xd9   : > { %998 = vrsqrt.f32 %v492_v61  ;;  %vm501_vm12 = vcmp.eq.f32.partialorder %v492_v61, inf  ;;  %v504_v15 = vand.u32 2147483648, %v492_v61  ;;  %vm503_vm13 = vcmp.eq.f32.partialorder %v492_v61, 0.0 }
  0xda   : > { %1000 = vrsqrt.f32 %v493_v62  ;;  %vm513_vm14 = vcmp.eq.f32.partialorder %v493_v62, inf  ;;  %v516_v18 = vand.u32 2147483648, %v493_v62  ;;  %vm515_vm15 = vcmp.eq.f32.partialorder %v493_v62, 0.0 }
  0xdf   : > { %v999_v63 = vpop.eup %998 }
  0xe0   : > { %v1001_v0 = vpop.eup %1000  ;;  %v495_v1 = vmul.f32 %v999_v63, %v492_v61 }
  0xe1   : > { %v507_v2 = vmul.f32 %v1001_v0, %v493_v62 }
  0xe2   : > { %v496_v3 = vmul.f32 %v999_v63, %v495_v1 }
  0xe3   : > { %v508_v4 = vmul.f32 %v1001_v0, %v507_v2 }
  0xe4   : > { %v497_v5 = vmul.f32 0.5, %v496_v3 }
  0xe5   : > { %v509_v6 = vmul.f32 0.5, %v508_v4 }
  0xe6   : > { %v498_v7 = vsub.f32 1.5, %v497_v5 }
  0xe7   : > { %v510_v8 = vsub.f32 1.5, %v509_v6 }
  0xe8   : > { %v499_v9 = vmul.f32 %v999_v63, %v498_v7 }
  0xe9   : > { %v511_v10 = vmul.f32 %v1001_v0, %v510_v8 }
  0xea   : > { %v500_v11 = vmul.f32 %v499_v9, %v492_v61 }
  0xeb   : > { %v512_v16 = vmul.f32 %v511_v10, %v493_v62 }
  0xec   : > { %v502_v17 = vsel %vm501_vm12, %v492_v61, %v500_v11 }
  0xed   : > { %v505_v20 = vsel %vm503_vm13, %v504_v15, %v502_v17  ;;  %v514_v21 = vsel %vm513_vm14, %v493_v62, %v512_v16 }
  0xee   : > { %v518_v22 = vsel %vm441_vm2, %v505_v20, %v443_v12  ;;  %v517_v24 = vsel %vm515_vm15, %v516_v18, %v514_v21 }
  0xef   : > { %v524_v25 = vmul.f32 %v520_v39, %v518_v22  ;;  %v519_v26 = vsel %vm442_vm3, %v517_v24, %v444_v19 }
  0xf0   : > { %v525_v28 = vmul.f32 %v521_v47, %v519_v26  ;;  %539 = sbr.rel (%p941_p10) target bundleno = 513 (0x201), region = 83 }
  0xf1   : > { %v526_v29 = vadd.f32 %v524_v25, %v522_v23 }
  0xf2   : > { %v527_v30 = vadd.f32 %v525_v28, %v523_v27 }
  0xf3   : > { %528 = vst [vmem:[#allocation2] sm:$0xff] %v526_v29 }
  0xf4   : > { %529 = vst [vmem:[#allocation2 + $0x8] sm:$0xff] %v527_v30 }
  0xf5   : > { %v552_v13 = vld [vmem:[#allocation3 + $0x8] sm:$0xff]  ;;  %v553_v34 = vld [vmem:[#allocation3] sm:$0xff]  ;;  %v1190_v14 = vld [vmem:[%s1541_s4 + $0x11] sm:$0x1]  ;;  %vm802_vm10 = vcmask 114688  }
  0xf6   : > { %v1185_v35 = vld [vmem:[%s1541_s4 + $0x1] sm:$0x1]  ;;  %v1195_v36 = vld [vmem:[%s1541_s4 + $0x2] sm:$0x1]  ;;  %v1200_v37 = vld [vmem:[%s1541_s4 + $0x12] sm:$0x1]  ;;  %v554_v40 = vadd.f32 %v553_v34, %v552_v13 }
  0xf7   : > { %v570_v38 = vld [vmem:[%s1541_s4 + $0x3] sm:$0x1]  ;;  %v571_v39 = vld [vmem:[%s1541_s4 + $0x13] sm:$0x1]  ;;  %v1211_v41 = vld [vmem:[%s1541_s4 + $0x4] sm:$0x1] }
  0xf8   : > { %v1216_v42 = vld [vmem:[%s1541_s4 + $0x14] sm:$0x1]  ;;  %v574_v43 = vld [vmem:[%s1541_s4 + $0x5] sm:$0x1]  ;;  %v1222_v44 = vmul.f32 %v570_v38, %v1195_v36  ;;  %v1225_v45 = vmul.f32 %v571_v39, %v1200_v37  ;;  %v1230_v46 = vld [vmem:[%s1541_s4 + $0x15] sm:$0x1]  ;;  %v1247_v50 = vmul.f32 %v1211_v41, %v1195_v36  ;;  %v1250_v51 = vmul.f32 %v570_v38, %v1185_v35 }
  0xf9   : > { %v1235_v47 = vld [vmem:[%s1541_s4 + $0x6] sm:$0x1]  ;;  %v1240_v48 = vld [vmem:[%s1541_s4 + $0x16] sm:$0x1]  ;;  %v1243_v49 = vmul.f32 %v574_v43, %v1185_v35  ;;  %v1253_v52 = vmul.f32 %v571_v39, %v1190_v14  ;;  %v1258_v53 = vld [vmem:[%s1541_s4 + $0x7] sm:$0x1]  ;;  %v659_v10 = vmul.f32 %v1216_v42, %v1200_v37  ;;  %v657_v34 = vmul.f32 %v1230_v46, %v1190_v14 }
  0xfa   : > { %v540_v31 = vld [vmem:[#allocation2] sm:$0xff]  ;;  %v1263_v54 = vld [vmem:[%s1541_s4 + $0x17] sm:$0x1]  ;;  %v596_v56 = vmul.f32 %v1235_v47, %v574_v43  ;;  %v597_v57 = vmul.f32 %v1240_v48, %v1230_v46  ;;  %v608_v58 = vmul.f32 %v1235_v47, %v1211_v41  ;;  %v609_v59 = vmul.f32 %v1240_v48, %v1216_v42  ;;  %v1278_v60 = vld [vmem:[%s1541_s4 + $0x18] sm:$0x1] }
  0xfb   : > { %v541_v32 = vld [vmem:[#allocation2 + $0x8] sm:$0xff]  ;;  %v580_v55 = vld [vmem:[%s1541_s4 + $0x8] sm:$0x1]  ;;  %v590_v62 = vmul.f32 %v1258_v53, %v574_v43  ;;  %v591_v63 = vmul.f32 %v1263_v54, %v1230_v46  ;;  %v1287_v1 = vld [vmem:[%s1541_s4] sm:$0x1]  ;;  %v589_v2 = vmul.f32 %v1278_v60, %v1216_v42  ;;  %v599_v3 = vmul.f32 %v1278_v60, %v571_v39 }
  0xfc   : > { %v542_v33 = vadd.f32 %v541_v32, %v540_v31  ;;  %v588_v61 = vmul.f32 %v580_v55, %v1211_v41  ;;  %v598_v0 = vmul.f32 %v580_v55, %v570_v38  ;;  %v606_v4 = vmul.f32 %v1258_v53, %v570_v38  ;;  %v1297_v6 = vld [vmem:[%s1541_s4 + $0x10] sm:$0x1]  ;;  %v582_v17 = vld [vmem:[%s1542_s5] sm:$0x1]  ;;  %v583_v22 = vld [vmem:[%s1542_s5 + $0x4] sm:$0x1] }
  0xfd   : > { %v607_v5 = vmul.f32 %v1263_v54, %v571_v39  ;;  %v646_v9 = vmul.f32 %v1258_v53, %v1195_v36  ;;  %v593_v11 = vsub.f32 %v589_v2, %v591_v63  ;;  %v601_v12 = vsub.f32 %v597_v57, %v599_v3  ;;  %v1317_v23 = vld [vmem:[%s1542_s5 + $0x1] sm:$0x1]  ;;  %v1329_v32 = vld [vmem:[%s1542_s5 + $0x2] sm:$0x1]  ;;  %v1346_v63 = vld [vmem:[%s1542_s5 + $0x6] sm:$0x1] }
  0xfe   : > { %543 = vadd.xlane.f32.xlu0 %v542_v33  ;;  %v592_v7 = vsub.f32 %v588_v61, %v590_v62  ;;  %v600_v8 = vsub.f32 %v596_v56, %v598_v0  ;;  %v610_v15 = vsub.f32 %v606_v4, %v608_v58  ;;  %v647_v20 = vmul.f32 %v1263_v54, %v1200_v37 }
  0xff   : > { %v611_v16 = vsub.f32 %v607_v5, %v609_v59  ;;  %v648_v21 = vmul.f32 %v580_v55, %v1185_v35  ;;  %v595_v24 = vmul.f32 %v593_v11, %v1297_v6  ;;  %v603_v25 = vmul.f32 %v601_v12, %v1190_v14 }
 0x100   : > { %v594_v18 = vmul.f32 %v592_v7, %v1287_v1  ;;  %v602_v19 = vmul.f32 %v600_v8, %v1185_v35  ;;  %v612_v26 = vmul.f32 %v610_v15, %v1195_v36  ;;  %v649_v29 = vmul.f32 %v1278_v60, %v1190_v14 }
 0x101   : > { %v613_v27 = vmul.f32 %v611_v16, %v1200_v37  ;;  %v650_v30 = vsub.f32 %v646_v9, %v648_v21  ;;  %v684_v31 = vmul.f32 %v574_v43, %v1287_v1  ;;  %v605_v33 = vadd.f32 %v603_v25, %v595_v24  ;;  %v1339_v43 = vld [vmem:[%s1542_s5 + $0x5] sm:$0x1] }
 0x102   : > { %v604_v28 = vadd.f32 %v602_v19, %v594_v18  ;;  %v644_v13 = vmul.f32 %v592_v7, %v582_v17  ;;  %v660_v38 = vsub.f32 %v1243_v49, %v1247_v50  ;;  %v651_v56 = vsub.f32 %v647_v20, %v649_v29 }
 0x103   : > { %v652_v57 = vmul.f32 %v650_v30, %v1317_v23  ;;  %v1341_v58 = vadd.f32 %v613_v27, %v605_v33  ;;  %v661_v59 = vsub.f32 %v657_v34, %v659_v10  ;;  %v670_v61 = vmul.f32 %v600_v8, %v582_v17 }
 0x104   : > { %v614_v39 = vadd.f32 %v612_v26, %v604_v28  ;;  %v671_v62 = vmul.f32 %v601_v12, %v583_v22  ;;  %v662_v50 = vmul.f32 %v660_v38, %v1329_v32  ;;  %v672_v0 = vmul.f32 %v580_v55, %v1287_v1 }
 0x105   : > { %v641_v3 = vand.u32 2147483648, %v1341_v58  ;;  %vm635_vm1 = vweird.f32 %v1341_v58  ;;  %v639_v4 = vand.u32 2147483647, %v1341_v58  ;;  %v653_v5 = vmul.f32 %v651_v56, %v1339_v43 }
 0x106   : > { %555 = vadd.xlane.f32.xlu0 %v554_v40  ;;  %v645_v40 = vmul.f32 %v593_v11, %v583_v22  ;;  %1002 = vrcp.f32 %v614_v39  ;;  %v627_v49 = vand.u32 2147483648, %v614_v39  ;;  %vm621_vm0 = vweird.f32 %v614_v39 }
 0x107   : > { %v625_v2 = vand.u32 2147483647, %v614_v39  ;;  %1004 = vrcp.f32 %v1341_v58  ;;  %v654_v7 = vadd.f32 %v652_v57, %v644_v13  ;;  %v1357_v9 = vor.u32 1.1754944e-38, %v641_v3  ;;  %v1430_v3 = vld [vmem:[%s1544_s7 + $0x1] sm:$0x1] }
 0x108   : > { %v1355_v8 = vor.u32 1.1754944e-38, %v627_v49  ;;  %v663_v10 = vmul.f32 %v661_v59, %v1346_v63  ;;  %v673_v55 = vmul.f32 %v1278_v60, %v1297_v6  ;;  %v655_v11 = vadd.f32 %v653_v5, %v645_v40  ;;  %v726_v5 = vld [vmem:[%s1544_s7 + $0x2] sm:$0x1] }
 0x109   : > { %v1362_v12 = vadd.f32 %v662_v50, %v654_v7  ;;  %v674_v18 = vmul.f32 %v1235_v47, %v1195_v36  ;;  %v675_v19 = vmul.f32 %v1240_v48, %v1200_v37  ;;  %vm1368_vm2 = vcmp.eq.f32.partialorder %v625_v2, 8.507059e+37  ;;  %v727_v7 = vld [vmem:[%s1544_s7 + $0x6] sm:$0x1] }
 0x10a   : > { %v685_v21 = vmul.f32 %v1230_v46, %v1297_v6  ;;  %v686_v24 = vsub.f32 %v1222_v44, %v684_v31  ;;  %v696_v25 = vmul.f32 %v610_v15, %v582_v17  ;;  %v1375_v60 = vmul.f32 %v611_v16, %v583_v22 }
 0x10b   : > { %vm1377_vm3 = vcmp.eq.f32.partialorder %v639_v4, 8.507059e+37  ;;  %v1381_v36 = vadd.f32 %v663_v10, %v655_v11  ;;  %v666_v37 = vsub.f32 0.0, %v1362_v12  ;;  %v676_v28 = vsub.f32 %v672_v0, %v674_v18  ;;  %v728_v10 = vld [vmem:[%s1543_s6] sm:$0x1]  ;;  %v732_v18 = vld [vmem:[%s1543_s6 + $0x3] sm:$0x1] }
 0x10c   : > { %v1003_v26 = vpop.eup %1002  ;;  %v677_v29 = vsub.f32 %v673_v55, %v675_v19  ;;  %v687_v46 = vsub.f32 %v1225_v45, %v685_v21  ;;  %v688_v44 = vmul.f32 %v686_v24, %v1329_v32  ;;  %v698_v34 = vmul.f32 %v1235_v47, %v1185_v35  ;;  %v729_v55 = vld [vmem:[%s1543_s6 + $0x10] sm:$0x1]  ;;  %v733_v19 = vld [vmem:[%s1543_s6 + $0x13] sm:$0x1]  ;;  %v738_v21 = vld [vmem:[%s1543_s6 + $0x6] sm:$0x1] }
 0x10d   : > { %v1005_v30 = vpop.eup %1004  ;;  %v617_v33 = vmul.f32 %v1003_v26, %v614_v39  ;;  %vm622_vm4 = vweird.f32 %v1003_v26  ;;  %v667_v16 = vsub.f32 0.0, %v1381_v36  ;;  %v678_v17 = vmul.f32 %v676_v28, %v1317_v23 }
 0x10e   : > { %v631_v15 = vmul.f32 %v1005_v30, %v1341_v58  ;;  %vm636_vm5 = vweird.f32 %v1005_v30  ;;  %v679_v31 = vmul.f32 %v677_v29, %v1339_v43  ;;  %v689_v13 = vmul.f32 %v687_v46, %v1346_v63  ;;  %vm1403_vm6 = vmor %vm621_vm0, %vm622_vm4  ;;  %v723_v58 = vld [vmem:[%s1544_s7 + $0x4] sm:$0x1] }
 0x10f   : > { %v618_v22 = vsub.f32 1.0, %v617_v33  ;;  %v680_v40 = vadd.f32 %v678_v17, %v670_v61  ;;  %v699_v45 = vmul.f32 %v1240_v48, %v1190_v14  ;;  %v700_v56 = vmul.f32 %v1258_v53, %v1287_v1  ;;  %vm1412_vm7 = vmor %vm635_vm1, %vm636_vm5  ;;  %v750_v46 = vld [vmem:[%s1543_s6 + $0x4] sm:$0x1] }
 0x110   : > { %v632_v38 = vsub.f32 1.0, %v631_v15  ;;  %v681_v59 = vadd.f32 %v679_v31, %v671_v62  ;;  %v701_v49 = vmul.f32 %v1263_v54, %v1297_v6  ;;  %v708_v50 = vmul.f32 %v1211_v41, %v1287_v1  ;;  %v1420_v62 = vld [vmem:[%s1544_s7] sm:$0x1]  ;;  %v756_v15 = vld [vmem:[%s1543_s6 + $0x7] sm:$0x1] }
 0x111   : > { %v619_v57 = vmul.f32 %v1003_v26, %v618_v22  ;;  %v690_v61 = vadd.f32 %v688_v44, %v680_v40  ;;  %v702_v14 = vsub.f32 %v698_v34, %v700_v56  ;;  %v709_v48 = vmul.f32 %v1216_v42, %v1297_v6  ;;  %v751_v44 = vld [vmem:[%s1543_s6 + $0x14] sm:$0x1]  ;;  %v764_v56 = vld [vmem:[%s1543_s6 + $0x2] sm:$0x1] }
 0x112   : > { %v633_v47 = vmul.f32 %v1005_v30, %v632_v38  ;;  %v691_v41 = vadd.f32 %v689_v13, %v681_v59  ;;  %v703_v1 = vsub.f32 %v699_v45, %v701_v49  ;;  %v712_v39 = vsub.f32 %v708_v50, %v1250_v51  ;;  %v1435_v51 = vld [vmem:[%s1544_s7 + $0x5] sm:$0x1]  ;;  %v757_v13 = vld [vmem:[%s1543_s6 + $0x17] sm:$0x1] }
 0x113   : > { %v620_v53 = vadd.f32 %v1003_v26, %v619_v57  ;;  %v692_v2 = vsub.f32 0.0, %v690_v61  ;;  %v704_v42 = vmul.f32 %v702_v14, %v1317_v23  ;;  %v713_v6 = vsub.f32 %v709_v48, %v1253_v52  ;;  %v765_v57 = vld [vmem:[%s1543_s6 + $0x12] sm:$0x1]  ;;  %v769_v61 = vld [vmem:[%s1543_s6 + $0x15] sm:$0x1] }
 0x114   : > { %v634_v0 = vadd.f32 %v1005_v30, %v633_v47  ;;  %v705_v23 = vmul.f32 %v703_v1, %v1339_v43  ;;  %v714_v52 = vmul.f32 %v712_v39, %v1329_v32  ;;  %v693_v24 = vsub.f32 0.0, %v691_v41  ;;  %v768_v47 = vld [vmem:[%s1543_s6 + $0x5] sm:$0x1]  ;;  %v774_v41 = vld [vmem:[%s1543_s6 + $0x8] sm:$0x1] }
 0x115   : > { %v624_v4 = vsel %vm1403_vm6, %v1003_v26, %v620_v53  ;;  %v706_v11 = vadd.f32 %v704_v42, %v696_v25  ;;  %v715_v12 = vmul.f32 %v713_v6, %v1346_v63  ;;  %v739_v25 = vld [vmem:[%s1543_s6 + $0x16] sm:$0x1]  ;;  %v746_v26 = vld [vmem:[%s1543_s6 + $0x1] sm:$0x1]  ;;  %v735_v33 = vmul.f32 %v733_v19, %v1435_v51  ;;  %v775_v1 = vld [vmem:[%s1543_s6 + $0x18] sm:$0x1] }
 0x116   : > { %v629_v32 = vsel %vm1368_vm2, %v1355_v8, %v624_v4  ;;  %v638_v43 = vsel %vm1412_vm7, %v1005_v30, %v634_v0  ;;  %v707_v63 = vadd.f32 %v705_v23, %v1375_v60  ;;  %v730_v30 = vmul.f32 %v728_v10, %v1420_v62 }
 0x117   : > { %v643_v8 = vsel %vm1377_vm3, %v1357_v9, %v638_v43  ;;  %v668_v20 = vmul.f32 %v666_v37, %v629_v32  ;;  %v694_v28 = vmul.f32 %v692_v2, %v629_v32  ;;  %v716_v29 = vadd.f32 %v714_v52, %v706_v11  ;;  %v747_v9 = vld [vmem:[%s1543_s6 + $0x11] sm:$0x1] }
 0x118   : > { %v669_v36 = vmul.f32 %v667_v16, %v643_v8  ;;  %v717_v27 = vadd.f32 %v715_v12, %v707_v63  ;;  %v731_v37 = vmul.f32 %v729_v55, %v723_v58  ;;  %v734_v60 = vmul.f32 %v732_v18, %v1430_v3 }
 0x119   : > { %v718_v16 = vsub.f32 0.0, %v716_v29  ;;  %v740_v17 = vmul.f32 %v738_v21, %v726_v5  ;;  %v741_v22 = vmul.f32 %v739_v25, %v727_v7  ;;  %v748_v31 = vmul.f32 %v746_v26, %v1420_v62 }
 0x11a   : > { %v695_v34 = vmul.f32 %v693_v24, %v643_v8  ;;  %v736_v38 = vadd.f32 %v734_v60, %v730_v30  ;;  %v737_v40 = vadd.f32 %v735_v33, %v731_v37  ;;  %v749_v45 = vmul.f32 %v747_v9, %v723_v58 }
 0x11b   : > { %v719_v59 = vsub.f32 0.0, %v717_v27  ;;  %v752_v49 = vmul.f32 %v750_v46, %v1430_v3  ;;  %v753_v50 = vmul.f32 %v751_v44, %v1435_v51  ;;  %v758_v35 = vmul.f32 %v756_v15, %v726_v5 }
 0x11c   : > { %v720_v14 = vmul.f32 %v718_v16, %v629_v32  ;;  %v742_v48 = vadd.f32 %v740_v17, %v736_v38  ;;  %v743_v53 = vadd.f32 %v741_v22, %v737_v40  ;;  %v759_v54 = vmul.f32 %v757_v13, %v727_v7 }
 0x11d   : > { %v754_v39 = vadd.f32 %v752_v49, %v748_v31  ;;  %v755_v0 = vadd.f32 %v753_v50, %v749_v45  ;;  %v766_v2 = vmul.f32 %v764_v56, %v1420_v62  ;;  %v767_v42 = vmul.f32 %v765_v57, %v723_v58 }
 0x11e   : > { %v744_v6 = vadd.f32 %v742_v48, %v668_v20  ;;  %v745_v4 = vadd.f32 %v743_v53, %v669_v36  ;;  %v770_v23 = vmul.f32 %v768_v47, %v1430_v3  ;;  %v771_v52 = vmul.f32 %v769_v61, %v1435_v51 }
 0x11f   : > { %v760_v10 = vadd.f32 %v758_v35, %v754_v39  ;;  %v761_v55 = vadd.f32 %v759_v54, %v755_v0  ;;  %v776_v32 = vmul.f32 %v774_v41, %v726_v5  ;;  %v777_v43 = vmul.f32 %v775_v1, %v727_v7 }
 0x120   : > { %v721_v11 = vmul.f32 %v719_v59, %v643_v8  ;;  %v772_v12 = vadd.f32 %v770_v23, %v766_v2  ;;  %v773_v18 = vadd.f32 %v771_v52, %v767_v42  ;;  %v782_v19 = vsub.f32 %v745_v4, %v744_v6 }
 0x121   : > { %v762_v21 = vadd.f32 %v760_v10, %v694_v28  ;;  %v763_v24 = vadd.f32 %v761_v55, %v695_v34  ;;  %v1055_v50 = vmov 15.0  }
 0x122   : > { %v778_v63 = vadd.f32 %v776_v32, %v772_v12  ;;  %v779_v25 = vadd.f32 %v777_v43, %v773_v18  ;;  %v785_v58 = vmul.f32 %v782_v19, %v782_v19 }
 0x123   : > { %v783_v62 = vsub.f32 %v763_v24, %v762_v21 }
 0x124   : > { %v780_v20 = vadd.f32 %v778_v63, %v720_v14  ;;  %v781_v26 = vadd.f32 %v779_v25, %v721_v11 }
 0x125   : > { %v786_v36 = vmul.f32 %v783_v62, %v783_v62 }
 0x126   : > { %v784_v3 = vsub.f32 %v781_v26, %v780_v20 }
 0x127   : > { %v787_v29 = vadd.f32 %v786_v36, %v785_v58 }
 0x128   : > { %v788_v51 = vmul.f32 %v784_v3, %v784_v3 }
 0x12a   : > { %v789_v30 = vadd.f32 %v788_v51, %v787_v29 }
 0x12c   : > { %1006 = vrsqrt.f32 %v789_v30  ;;  %vm797_vm8 = vcmp.eq.f32.partialorder %v789_v30, inf  ;;  %v800_v28 = vand.u32 2147483648, %v789_v30  ;;  %vm799_vm9 = vcmp.eq.f32.partialorder %v789_v30, 0.0 }
 0x12d   : > { %1008 = vrcp.f32 %v1055_v50 }
 0x132   : > { %v1007_v5 = vpop.eup %1006 }
 0x133   : > { %v791_v7 = vmul.f32 %v1007_v5, %v789_v30  ;;  %v1009_v35 = vpop.eup %1008 }
 0x134   : > { %v814_v47 = vmul.f32 15.0, %v1009_v35  ;;  %vm818_vm11 = vweird.f32 %v1009_v35 }
 0x135   : > { %v792_v8 = vmul.f32 %v1007_v5, %v791_v7 }
 0x136   : > { %v815_v14 = vsub.f32 1.0, %v814_v47 }
 0x137   : > { %v793_v9 = vmul.f32 0.5, %v792_v8 }
 0x138   : > { %v816_v1 = vmul.f32 %v1009_v35, %v815_v14 }
 0x139   : > { %v794_v27 = vsub.f32 1.5, %v793_v9 }
 0x13a   : > { %v817_v6 = vadd.f32 %v1009_v35, %v816_v1 }
 0x13b   : > { %v795_v37 = vmul.f32 %v1007_v5, %v794_v27 }
 0x13c   : > { %v819_v43 = vsel %vm818_vm11, %v1009_v35, %v817_v6 }
 0x13d   : > { %v796_v60 = vmul.f32 %v795_v37, %v789_v30 }
 0x13f   : > { %v798_v33 = vsel %vm797_vm8, %v789_v30, %v796_v60 }
 0x140   : > { %v801_v46 = vsel %vm799_vm9, %v800_v28, %v798_v33 }
 0x141   : > { %v803_v44 = vsel %vm802_vm10, %v801_v46, 0.0 }
 0x142   : > { %804 = vadd.xlane.f32.xlu1 %v803_v44 }
 0x171   : > { %v544_v15 = vpop.xlane.xlu0 %543 }
 0x172   : > { %v545_v16 = vrot.slane %v544_v15, 4 }
 0x174   : > { %v546_v17 = vadd.f32 %v545_v16, %v544_v15 }
 0x176   : > { %v547_v22 = vrot.slane %v546_v17, 2 }
 0x178   : > { %v548_v31 = vadd.f32 %v547_v22, %v546_v17 }
 0x179   : > { %v556_v13 = vpop.xlane.xlu0 %555 }
 0x17a   : > { %v557_v34 = vrot.slane %v556_v13, 4  ;;  %v549_v38 = vrot.slane %v548_v31, 1 }
 0x17c   : > { %v558_v40 = vadd.f32 %v557_v34, %v556_v13  ;;  %v550_v45 = vadd.f32 %v549_v38, %v548_v31 }
 0x17e   : > { %v559_v56 = vrot.slane %v558_v40, 2  ;;  %951 = vpush %v550_v45 }
 0x180   : > { %v560_v57 = vadd.f32 %v559_v56, %v558_v40 }
 0x182   : > { %v561_v59 = vrot.slane %v560_v57, 1 }
 0x184   : > { %v562_v49 = vadd.f32 %v561_v59, %v560_v57 }
 0x186   : > { %953 = vpush %v562_v49 }
 0x1af   : > { %s1520_s22 = spop %951 }
 0x1b5   : > { %v805_v48 = vpop.xlane.xlu1 %804 }
 0x1b6   : > { %v806_v53 = vrot.slane %v805_v48, 4 }
 0x1b7   : > { %s954_s23 = spop %953 }
 0x1b8   : > { %v822_v61 = vstv %s954_s23  ;;  %v807_v41 = vadd.f32 %v806_v53, %v805_v48 }
 0x1b9   : > { %1010 = vrcp.f32 %v822_v61  ;;  %v834_v4 = vand.u32 2147483648, %v822_v61  ;;  %v832_v52 = vand.u32 2147483647, %v822_v61  ;;  %vm828_vm13 = vweird.f32 %v822_v61 }
 0x1ba   : > { %v808_v0 = vrot.slane %v807_v41, 2 }
 0x1bb   : > { %v835_v11 = vor.u32 1.1754944e-38, %v834_v4  ;;  %vm833_vm15 = vcmp.eq.f32.partialorder %v832_v52, 8.507059e+37 }
 0x1bc   : > { %v809_v42 = vadd.f32 %v808_v0, %v807_v41 }
 0x1be   : > { %v810_v10 = vrot.slane %v809_v42, 1 }
 0x1bf   : > { %v1011_v54 = vpop.eup %1010 }
 0x1c0   : > { %v824_v39 = vmul.f32 %v1011_v54, %v822_v61  ;;  %vm829_vm12 = vweird.f32 %v1011_v54  ;;  %v811_v32 = vadd.f32 %v810_v10, %v809_v42 }
 0x1c1   : > { %vm830_vm14 = vmor %vm828_vm13, %vm829_vm12 }
 0x1c2   : > { %v825_v2 = vsub.f32 1.0, %v824_v39  ;;  %955 = vpush %v811_v32 }
 0x1c3   : > { %957 = vpush %v819_v43 }
 0x1c4   : > { %v826_v23 = vmul.f32 %v1011_v54, %v825_v2 }
 0x1c6   : > { %v827_v55 = vadd.f32 %v1011_v54, %v826_v23 }
 0x1c8   : > { %v831_v12 = vsel %vm830_vm14, %v1011_v54, %v827_v55 }
 0x1c9   : > { %v836_v18 = vsel %vm833_vm15, %v835_v11, %v831_v12 }
 0x1ca   : > { %959 = vpush %v836_v18 }
 0x1f3   : > { %s956_s24 = spop %955 }
 0x1f4   : > { %s958_s25 = spop %957 }
 0x1f5   : > { %s821_s26 = smul.f32 %s958_s25, %s956_s24 }
 0x1fb   : > { %s960_s10 = spop %959 }
 0x1fc   : > { %s838_s11 = smul.f32 %s960_s10, %s1520_s22 }
 0x1fe   : > { %s839_s13 = sadd.f32 %s838_s11, %s821_s26 }
 0x200   : > { %841 = sst [smem:[#allocation5]] %s839_s13 }
 0x201 PF: > { %p965_p11 = scmp.eq.s32.totalorder %s1118_s30, 1  ;;  %s848_s27 = sshll.u32 %s1545_s8, 4  ;;  %s849_s27 = int_to_ptr.hbm [resolvable:$true] %s848_s27 }
 0x202   : > { %s1056_s15 = smov [#allocation5]  }
 0x203   : > { %962 = dma.smem_to_hbm (%p965_p11), %s1056_s15, 16, %s849_s27, [#allocation6]  }
 0x204   : > { %1039 = dma.done.wait (%p965_p11), [#allocation6], 16  }
 0x205   : > { %1041 = vsyncadd (%p965_p11), [#allocation6], 4294967280 }
 0x206   : > { %857 = sfence }
 0x207 PF: > { %p16_p12 = scmp.ge.s32.totalorder %s1121_s9, 4   ;;  %s1554_s27 = smov %s1048_s28 }
 0x208   : > { %s1555_s28 = smov %s1130_s12  ;;  %s1556_s29 = smov %s1121_s9 }
 0x209   :  { %18 = sbr.rel (!%p16_p12) target bundleno = 2 (0x2), region = 123 }
 0x20e   :  { %863 = vsyncpa [#allocation6], 1 }
 0x20f   :  { %865 = vsyncpa [#allocation6 + $0x1], 1 }

</bundles_post_ra>
